<compile_context>
chip_gen: v7x
topology: tpu7x:2x2x1
jax: 0.10.0
libtpu: 0.0.40
codegen_flags: <defaults>
</compile_context>

<pallas_src>
import functools

import jax
import jax.numpy as jnp
from jax.experimental import pallas as pl
from jax.experimental.pallas import tpu as pltpu

F32 = jnp.float32
BF16 = jnp.bfloat16


def _ru(x, m):
    return ((x + m - 1) // m) * m


def _pick_tile(padded, candidates):
    for c in candidates:
        if padded % c == 0:
            return c
    return candidates[-1]


# --------------------------------------------------------------------------
# Fused, tiled matmul kernel (MXU) with configurable epilogue
# --------------------------------------------------------------------------
def _mm_fused_kernel(*refs, epilogue, has_den, has_extra, scale0, scale1):
    a_ref, b_ref, bias_ref = refs[0], refs[1], refs[2]
    pos = 3
    den_ref = extra_ref = None
    if has_den:
        den_ref = refs[pos]
        pos += 1
    if has_extra:
        extra_ref = refs[pos]
        pos += 1
    o_ref, acc_ref = refs[pos], refs[pos + 1]

    @pl.when(pl.program_id(2) == 0)
    def _():
        acc_ref[...] = jnp.zeros_like(acc_ref)

    acc_ref[...] += jnp.dot(a_ref[...], b_ref[...],
                            preferred_element_type=jnp.float32)

    @pl.when(pl.program_id(2) == pl.num_programs(2) - 1)
    def _():
        acc = acc_ref[...]
        if has_den:  # sparsity-invariant conv normalization
            acc = acc / (den_ref[...] + 1e-8)
        acc = acc + bias_ref[...]
        if epilogue == "relu":
            res = jnp.maximum(acc, 0.0)
        elif epilogue == "sigmoid":
            res = jax.nn.sigmoid(acc)
        elif epilogue == "add_relu":        # residual add + relu
            res = jnp.maximum(acc + extra_ref[...], 0.0)
        elif epilogue == "res_sig":         # cam * (1 + sigmoid(att))
            res = extra_ref[...] * (1.0 + jax.nn.sigmoid(acc))
        elif epilogue == "disp":            # disp_to_depth scaling of sigmoid
            res = scale0 + scale1 * jax.nn.sigmoid(acc)
        else:
            res = acc
        o_ref[...] = res


def pallas_matmul_fused(a, w_pad, bias_pad, K, N, epilogue="none",
                        den=None, extra=None, scale0=0.0, scale1=1.0):
    """out = epilogue((a @ w) [/ den] + bias [, extra])

    a        : (M, K) f32 activations (unpadded) -> cast to bf16 inside
    w_pad    : (Kp, Np) bf16, pre-padded weight  (Kp=_ru(K,128), Np=_ru(N,128))
    bias_pad : (1, Np) f32, pre-padded
    den      : optional (M, 1) f32   (sparse-conv mask count)
    extra    : optional (M, N) f32   (shortcut / cam feature)
    """
    M = a.shape[0]
    Kp, Np = w_pad.shape

    tk = _pick_tile(Kp, (512, 256, 128))
    tn = _pick_tile(Np, (256, 128))
    m16 = _ru(M, 16)                       # bf16 sublane packing
    tm = m16 if m16 <= 256 else 256
    Mp = _ru(M, tm)

    a_p = jnp.zeros((Mp, Kp), BF16).at[:M, :K].set(a.astype(BF16))

    in_arrays = [a_p, w_pad, bias_pad]
    in_specs = [
        pl.BlockSpec((tm, tk), lambda i, j, k: (i, k)),
        pl.BlockSpec((tk, tn), lambda i, j, k: (k, j)),
        pl.BlockSpec((1, tn), lambda i, j, k: (0, j)),
    ]
    has_den = den is not None
    has_extra = extra is not None
    if has_den:
        den_p = jnp.zeros((Mp, 1), F32).at[:M, :].set(den.astype(F32))
        in_arrays.append(den_p)
        in_specs.append(pl.BlockSpec((tm, 1), lambda i, j, k: (i, 0)))
    if has_extra:
        ex_p = jnp.zeros((Mp, Np), F32).at[:M, :N].set(extra.astype(F32))
        in_arrays.append(ex_p)
        in_specs.append(pl.BlockSpec((tm, tn), lambda i, j, k: (i, j)))

    kernel = functools.partial(
        _mm_fused_kernel, epilogue=epilogue, has_den=has_den,
        has_extra=has_extra, scale0=scale0, scale1=scale1)

    out = pl.pallas_call(
        kernel,
        out_shape=jax.ShapeDtypeStruct((Mp, Np), F32),
        grid=(Mp // tm, Np // tn, Kp // tk),
        in_specs=in_specs,
        out_specs=pl.BlockSpec((tm, tn), lambda i, j, k: (i, j)),
        scratch_shapes=[pltpu.VMEM((tm, tn), F32)],
        compiler_params=pltpu.CompilerParams(
            dimension_semantics=("parallel", "parallel", "arbitrary")),
    )(*in_arrays)
    return out[:M, :N]


# --------------------------------------------------------------------------
# Tiled elementwise kernel: depth2inv
# --------------------------------------------------------------------------
def _depth2inv_kernel(d_ref, o_ref):
    d = d_ref[...]
    o_ref[...] = jnp.where(d > 0.0, 1.0 / jnp.maximum(d, 1e-6), 0.0)


def pallas_depth2inv(x):
    shape = x.shape
    total = x.size
    rows = _ru(total, 128) // 128
    tr = _ru(rows, 8) if _ru(rows, 8) <= 512 else 512
    Rp = _ru(rows, tr)
    buf = jnp.zeros((Rp * 128,), F32).at[:total].set(
        x.reshape(-1).astype(F32)).reshape(Rp, 128)
    out = pl.pallas_call(
        _depth2inv_kernel,
        out_shape=jax.ShapeDtypeStruct((Rp, 128), F32),
        grid=(Rp // tr,),
        in_specs=[pl.BlockSpec((tr, 128), lambda i: (i, 0))],
        out_specs=pl.BlockSpec((tr, 128), lambda i: (i, 0)),
        compiler_params=pltpu.CompilerParams(
            dimension_semantics=("parallel",)),
    )(buf)
    return out.reshape(-1)[:total].reshape(shape)


# --------------------------------------------------------------------------
# Conv helpers (im2col glue in JAX, fused matmul in Pallas)
# --------------------------------------------------------------------------
def _im2col(x, kh, kw, stride, padding, dilation=1):
    N, H, W, C = x.shape
    xp = jnp.pad(x, ((0, 0), (padding, padding), (padding, padding), (0, 0)))
    Ho = (H + 2 * padding - dilation * (kh - 1) - 1) // stride + 1
    Wo = (W + 2 * padding - dilation * (kw - 1) - 1) // stride + 1
    cols = []
    for i in range(kh):
        for j in range(kw):
            hi, wj = i * dilation, j * dilation
            cols.append(
                xp[:, hi: hi + (Ho - 1) * stride + 1: stride,
                      wj: wj + (Wo - 1) * stride + 1: stride, :])
    return jnp.concatenate(cols, axis=-1), Ho, Wo


def conv2d(x, p, stride=1, padding=1, dilation=1, epilogue="relu",
           extra=None, scale0=0.0, scale1=1.0):
    patches, Ho, Wo = _im2col(x, p["kh"], p["kw"], stride, padding, dilation)
    N = x.shape[0]
    a = patches.reshape(N * Ho * Wo, p["K"])
    extra2 = None
    if extra is not None:
        extra2 = extra.reshape(N * Ho * Wo, p["cout"])
    out = pallas_matmul_fused(a, p["w"], p["b"], p["K"], p["cout"],
                              epilogue=epilogue, extra=extra2,
                              scale0=scale0, scale1=scale1)
    return out.reshape(N, Ho, Wo, p["cout"])


def sparse_conv(x, mask, p, stride=1, padding=1):
    """Sparsity-invariant conv (Uhrig et al.): relu(conv(x*m)/(conv(m)+eps)+b).
    The normalization is fused into the matmul epilogue; the mask count is a
    cheap VPU row-sum of the (M, kh*kw) mask patches (no second matmul)."""
    N = x.shape[0]
    patches, Ho, Wo = _im2col(x * mask, p["kh"], p["kw"], stride, padding)
    a = patches.reshape(N * Ho * Wo, p["K"])
    mpatch, _, _ = _im2col(mask, p["kh"], p["kw"], stride, padding)
    den = mpatch.reshape(N * Ho * Wo, p["kh"] * p["kw"]).sum(
        axis=-1, keepdims=True)
    out = pallas_matmul_fused(a, p["w"], p["b"], p["K"], p["cout"],
                              epilogue="relu", den=den)
    new_mask = (den > 0).astype(F32).reshape(N, Ho, Wo, 1)
    return out.reshape(N, Ho, Wo, p["cout"]), new_mask


def sparse_conv1x1(x, mask, p):
    N, H, W, cin = x.shape
    a = (x * mask).reshape(N * H * W, cin)
    den = mask.reshape(N * H * W, 1)
    out = pallas_matmul_fused(a, p["w"], p["b"], p["K"], p["cout"],
                              epilogue="relu", den=den)
    return out.reshape(N, H, W, p["cout"]), mask


# --------------------------------------------------------------------------
# Deterministic parameter initialization (weights pre-padded / bf16 at init)
# --------------------------------------------------------------------------
class ParamGen:
    def __init__(self, seed=42):
        self.key = jax.random.PRNGKey(seed)
        self.count = 0

    def conv(self, kh, kw, cin, cout):
        self.count += 1
        k = jax.random.fold_in(self.key, self.count)
        std = (2.0 / (kh * kw * cin)) ** 0.5
        w = std * jax.random.normal(k, (kh, kw, cin, cout), F32)
        b = jnp.zeros((cout,), F32)
        K, N = kh * kw * cin, cout
        Kp, Np = _ru(K, 128), _ru(N, 128)
        w_pad = jnp.zeros((Kp, Np), BF16).at[:K, :N].set(
            w.reshape(K, N).astype(BF16))
        b_pad = jnp.zeros((1, Np), F32).at[0, :N].set(b)
        return dict(w=w_pad, b=b_pad, kh=kh, kw=kw, cin=cin, cout=cout, K=K)


ENC_CH = [64, 64, 128, 256, 512]      # resnet18 num_ch_enc
LIDAR_CH = [16, 32, 64, 128, 256]     # SparseConvEncoder([2,2,2,2]) channels
DEC_CH = [16, 32, 64, 128, 256]       # SkipDecoder channels


def init_params():
    g = ParamGen(42)
    p = {}
    # --- RGB ResNet18 encoder ---
    p["conv1"] = g.conv(7, 7, 3, 64)
    layers = []
    in_ch = 64
    for li, out_ch in enumerate([64, 128, 256, 512]):
        stage = []
        for bi in range(2):
            stride = 2 if (li > 0 and bi == 0) else 1
            blk = {
                "conv1": g.conv(3, 3, in_ch, out_ch),
                "conv2": g.conv(3, 3, out_ch, out_ch),
                "stride": stride,
            }
            if stride != 1 or in_ch != out_ch:
                blk["down"] = g.conv(1, 1, in_ch, out_ch)
            stage.append(blk)
            in_ch = out_ch
        layers.append(stage)
    p["layers"] = layers
    # --- lidar SparseConvEncoder ---
    p["lidar_conv0"] = g.conv(3, 3, 1, LIDAR_CH[0])
    lstages = []
    in_ch = LIDAR_CH[0]
    for out_ch in LIDAR_CH[1:]:
        lstages.append([g.conv(3, 3, in_ch, out_ch),
                        g.conv(3, 3, out_ch, out_ch)])
        in_ch = out_ch
    p["lidar_stages"] = lstages
    # --- extend_lidar (SparseConv1x1) ---
    p["extend"] = [g.conv(1, 1, LIDAR_CH[i], ENC_CH[i]) for i in range(5)]
    # --- AttentionGuidance ('res-sig'), fusion BN == identity (eval mode) ---
    p["guidance"] = [g.conv(3, 3, ENC_CH[i], ENC_CH[i]) for i in range(5)]
    # --- SkipDecoder ---
    p["dec"] = {}
    in_c = ENC_CH[4]
    for i in range(4, -1, -1):
        p["dec"][("upconv0", i)] = g.conv(3, 3, in_c, DEC_CH[i])
        c = DEC_CH[i] + (ENC_CH[i - 1] if i > 0 else 0)
        p["dec"][("upconv1", i)] = g.conv(3, 3, c, DEC_CH[i])
        in_c = DEC_CH[i]
    p["dispconv"] = g.conv(3, 3, DEC_CH[0], 1)
    return p


# --------------------------------------------------------------------------
# Network forward (mirrors GuidedSparseDepthResNet.forward)
# --------------------------------------------------------------------------
def basic_block(x, blk):
    out1 = conv2d(x, blk["conv1"], stride=blk["stride"], padding=1,
                  epilogue="relu")
    if "down" in blk:
        sc = conv2d(x, blk["down"], stride=blk["stride"], padding=0,
                    epilogue="none")
    else:
        sc = x
    # conv2 with residual add + relu fused into the matmul epilogue
    return conv2d(out1, blk["conv2"], stride=1, padding=1,
                  epilogue="add_relu", extra=sc)


def rgb_encoder(params, x):
    feats = []
    x = conv2d(x, params["conv1"], stride=2, padding=3, epilogue="relu")
    feats.append(x)  # /2
    # TODO(synk): maxpool stays as plain-JAX reduce_window glue.
    x = jax.lax.reduce_window(
        x, -float("inf"), jax.lax.max,
        (1, 3, 3, 1), (1, 2, 2, 1),
        padding=((0, 0), (1, 1), (1, 1), (0, 0)))
    for stage in params["layers"]:
        for blk in stage:
            x = basic_block(x, blk)
        feats.append(x)  # /4 /8 /16 /32
    return feats


def lidar_encoder(params, d):
    mask = (d > 0).astype(F32)
    feats, masks = [], []
    x, mask = sparse_conv(d, mask, params["lidar_conv0"], stride=2, padding=1)
    feats.append(x); masks.append(mask)
    for p1, p2 in params["lidar_stages"]:
        x, mask = sparse_conv(x, mask, p1, stride=2, padding=1)
        x, mask = sparse_conv(x, mask, p2, stride=1, padding=1)
        feats.append(x); masks.append(mask)
    return feats, masks


def attention_guidance(cam_f, lidar_f, p):
    # AttentionGuidance 'res-sig': cam + cam*sigmoid(conv(lidar)); fused.
    return conv2d(lidar_f, p, stride=1, padding=1, epilogue="res_sig",
                  extra=cam_f)


def upsample2(x):
    return jnp.repeat(jnp.repeat(x, 2, axis=1), 2, axis=2)


def skip_decoder(params, feats, min_disp, max_disp):
    x = feats[4]
    for i in range(4, -1, -1):
        x = conv2d(x, params["dec"][("upconv0", i)], epilogue="relu")
        x = upsample2(x)
        if i > 0:
            x = jnp.concatenate([x, feats[i - 1]], axis=-1)
        x = conv2d(x, params["dec"][("upconv1", i)], epilogue="relu")
    # dispconv: sigmoid + disp_to_depth(0.1, 120) scaling fused in epilogue
    disp = conv2d(x, params["dispconv"], epilogue="disp",
                  scale0=min_disp, scale1=max_disp - min_disp)
    return {"disp": disp}


def guided_sparse_depth_resnet_forward(params, cam_nchw, lidar_nchw):
    cam = jnp.transpose(cam_nchw, (0, 2, 3, 1)).astype(F32)
    lidar = jnp.transpose(lidar_nchw, (0, 2, 3, 1)).astype(F32)

    # inverse_lidar_input=True -> depth2inv
    lidar_inv = pallas_depth2inv(lidar)

    cam_feats = rgb_encoder(params, cam)
    lid_feats, lid_masks = lidar_encoder(params, lidar_inv)

    # extend_lidar: SparseConv1x1 lidar_ch[i] -> enc_ch[i]
    ext = []
    for i in range(5):
        f, _ = sparse_conv1x1(lid_feats[i], lid_masks[i], params["extend"][i])
        ext.append(f)

    # attention guidance fusion
    guided = [attention_guidance(cam_feats[i], ext[i], params["guidance"][i])
              for i in range(5)]

    # scale_inv_depth = disp_to_depth(min_depth=0.1, max_depth=120.0)[0]
    min_disp, max_disp = 1.0 / 120.0, 1.0 / 0.1
    preds = skip_decoder(params, guided, min_disp, max_disp)
    return {"disp": jnp.transpose(preds["disp"], (0, 3, 1, 2))}  # back to NCHW


# --------------------------------------------------------------------------
if __name__ == "__main__":
    key = jax.random.PRNGKey(0)
    k1, k2, k3 = jax.random.split(key, 3)
    B, H, W = 2, 32, 32  # 32x32 so the deepest /32 feature stays >= 1x1

    cam = jax.random.uniform(k1, (B, 3, H, W), F32)
    depth = jax.random.uniform(k2, (B, 1, H, W), F32, minval=1.0, maxval=80.0)
    sparse_mask = jax.random.uniform(k3, (B, 1, H, W), F32) < 0.05
    lidar = jnp.where(sparse_mask, depth, 0.0)  # sparse depth input

    params = init_params()
    out = guided_sparse_depth_resnet_forward(params, cam, lidar)
    disp = jax.block_until_ready(out["disp"])

    assert disp.shape == (B, 1, H, W), disp.shape
    assert bool(jnp.all(jnp.isfinite(disp)))
    print("KERNEL_OK")
</pallas_src>

<mosaic_0001>
module attributes {stable_mosaic.version = 11 : i64} {
  func.func @_depth2inv_kernel(%arg0: i32, %arg1: memref<16x128xf32, #tpu.memory_space<vmem>>, %arg2: memref<16x128xf32, #tpu.memory_space<vmem>>) attributes {dimension_semantics = [#tpu.dimension_semantics<parallel>], iteration_bounds = array<i64: 1>, scalar_prefetch = 0 : i64, scratch_operands = 0 : i64, tpu.core_type = #tpu.core_type<tc>, window_params = [{transform_indices = @transform_0, window_bounds = array<i64: 16, 128>}, {transform_indices = @transform_1, window_bounds = array<i64: 16, 128>}]} {
    %c0 = arith.constant 0 : index
    %c0_0 = arith.constant 0 : index
    %0 = vector.load %arg1[%c0, %c0_0] : memref<16x128xf32, #tpu.memory_space<vmem>>, vector<16x128xf32>
    %cst = arith.constant 0.000000e+00 : f32
    %1 = vector.broadcast %cst : f32 to vector<16x128xf32>
    %2 = arith.cmpf ogt, %0, %1 : vector<16x128xf32>
    %cst_1 = arith.constant 9.99999997E-7 : f32
    %3 = vector.broadcast %cst_1 : f32 to vector<16x128xf32>
    %4 = arith.maximumf %0, %3 : vector<16x128xf32>
    %cst_2 = arith.constant 1.000000e+00 : f32
    %5 = vector.broadcast %cst_2 : f32 to vector<16x128xf32>
    %6 = arith.divf %5, %4 : vector<16x128xf32>
    %cst_3 = arith.constant 0.000000e+00 : f32
    %7 = vector.broadcast %cst_3 : f32 to vector<16x128xf32>
    %8 = arith.select %2, %6, %7 : vector<16x128xi1>, vector<16x128xf32>
    %c0_4 = arith.constant 0 : index
    %c0_5 = arith.constant 0 : index
    %9 = vector.load %arg2[%c0_4, %c0_5] : memref<16x128xf32, #tpu.memory_space<vmem>>, vector<16x128xf32>
    tpu.vector_store %arg2[%c0_4, %c0_5], %8 {strides = array<i32>} : memref<16x128xf32, #tpu.memory_space<vmem>>, vector<16x128xf32>,
    return
  }
  func.func @transform_0(%arg0: i32) -> (i32, i32) {
    %c0_i32 = arith.constant 0 : i32
    %c0_i32_0 = arith.constant 0 : i32
    return %arg0, %c0_i32 : i32, i32
  }
  func.func @transform_1(%arg0: i32) -> (i32, i32) {
    %c0_i32 = arith.constant 0 : i32
    %c0_i32_0 = arith.constant 0 : i32
    return %arg0, %c0_i32 : i32, i32
  }
}

</mosaic_0001>

<bundles_post_ra>
// kernel: tpu_custom_call.1
= control target key start
LH: loop header
LB: loop body
LE: loop exit
PB: predicated region body
PF: predicated region fallthrough
CT: control target
= control target key end

     0   :  { %6 = vsyncpa [#allocation3], 0  ;;  %s154_s0 = inlined_call_operand.hbm [shape: f32[16,128], index: 0, kind: input, shape index: {}]   ;;  %s155_s1 = inlined_call_operand.hbm [shape: f32[16,128], index: 1, kind: output, shape index: {}]  }
   0x1   :  { %7 = vsyncpa [#allocation4], 0  ;;  %s110_s6 = smov [#allocation2]   ;;  %s62_s10 = scalar_lea.hbm %s154_s0, 256 }
   0x2   :  { %s13_s7 = sshll.u32 %s110_s6, 4  ;;  %p63_p0 = scmp.ne.s32.totalorder %s154_s0, %s62_s10  ;;  %s14_s7 = int_to_ptr.vmem [resolvable:$true] %s13_s7 }
   0x3   :  { %p66_p1 = scmp.lt.u32.totalorder %s62_s10, %s154_s0 }
   0x5   :  { %p68_p2 = pnand %p66_p1, %p63_p0 }
   0x7   :  { %71 = shalt.err (!%p68_p2)
}
   0x8   :  { %s72_s15 = scalar_lea.vmem %s14_s7, 256  ;;  %p77_p4 = scmp.lt.s32.totalorder %s14_s7, %s14_s7 }
   0x9   :  { %p73_p3 = scmp.ne.s32.totalorder %s14_s7, %s72_s15  ;;  %p78_p5 = scmp.lt.s32.totalorder %s72_s15, %s72_s15 }
   0xb   :  { %p79_p6 = por %p78_p5, %p77_p4 }
   0xd   :  { %p80_p7 = pnand %p79_p6, %p73_p3 }
   0xf   :  { %83 = shalt.err (!%p80_p7)
}
  0x10   :  { %s111_s16 = smov 128   ;;  %s112_s17 = smov 8  }
  0x11   :  { %19 = dma.hbm_to_vmem [thread:$0]  %s154_s0, 256, %s14_s7, [#allocation3], %s111_s16, %s111_s16, %s112_s17  }
  0x12   :  { %106 = dma.done.wait [#allocation3], 256  }
  0x13   :  { %107 = vsyncadd [#allocation3], 4294967040  ;;  %v23_v0 = vld [vmem:[#allocation2] sm:$0xff]  ;;  %v24_v1 = vld [vmem:[#allocation2 + $0x8] sm:$0xff]  ;;  %s113_s20 = smov [#allocation5]  }
  0x14   :  { %v27_v2 = vmax.f32 %v23_v0, 1e-06  ;;  %v28_v3 = vmax.f32 %v24_v1, 1e-06  ;;  %vm25_vm0 = vcmp.gt.f32.partialorder %v23_v0, 0.0  ;;  %s42_s21 = sshll.u32 %s113_s20, 4  ;;  %s43_s21 = int_to_ptr.vmem [resolvable:$true] %s42_s21 }
  0x15   :  { %vm26_vm1 = vcmp.gt.f32.partialorder %v24_v1, 0.0  ;;  %s84_s0 = scalar_lea.vmem %s43_s21, 256  ;;  %p89_p9 = scmp.lt.s32.totalorder %s43_s21, %s43_s21 }
  0x16   :  { %58 = vrcp.f32 %v27_v2  ;;  %p85_p8 = scmp.ne.s32.totalorder %s43_s21, %s84_s0  ;;  %p90_p10 = scmp.lt.s32.totalorder %s84_s0, %s84_s0 }
  0x17   :  { %60 = vrcp.f32 %v28_v3 }
  0x18   :  { %p91_p11 = por %p90_p10, %p89_p9 }
  0x1a   :  { %p92_p12 = pnand %p91_p11, %p85_p8 }
  0x20   :  { %v59_v4 = vpop.eup %58 }
  0x21   :  { %v61_v5 = vpop.eup %60  ;;  %v33_v6 = vsel %vm25_vm0, %v59_v4, 0.0 }
  0x22   :  { %35 = vst [vmem:[#allocation5] sm:$0xff] %v33_v6  ;;  %v34_v7 = vsel %vm26_vm1, %v61_v5, 0.0 }
  0x23   :  { %36 = vst [vmem:[#allocation5 + $0x8] sm:$0xff] %v34_v7 }
  0x24   :  { %95 = shalt.err (!%p92_p12)
}
  0x25   :  { %s96_s24 = scalar_lea.hbm %s155_s1, 256 }
  0x26   :  { %p97_p13 = scmp.ne.s32.totalorder %s155_s1, %s96_s24  ;;  %p100_p0 = scmp.lt.u32.totalorder %s96_s24, %s155_s1 }
  0x28   :  { %p102_p1 = pnand %p100_p0, %p97_p13 }
  0x2a   :  { %105 = shalt.err (!%p102_p1)
}
  0x2b   :  { %48 = dma.vmem_to_hbm [thread:$0]  %s43_s21, 256, %s155_s1, [#allocation4], %s111_s16, %s111_s16, %s112_s17  }
  0x2c   :  { %108 = dma.done.wait [#allocation4], 256  }
  0x2d   :  { %109 = vsyncadd [#allocation4], 4294967040 }
  0x2e   :  { %52 = vsyncpa [#allocation3], 1 }
  0x2f   :  { %53 = vsyncpa [#allocation4], 1 }

</bundles_post_ra>
